<compile_context>
chip_gen: v6e
topology: v6e:2x2x1
jax: 0.10.0
libtpu: 0.0.40
codegen_flags: <defaults>
</compile_context>

<pallas_src>
import functools

import jax
import jax.numpy as jnp
from jax import lax
from jax.experimental import pallas as pl
from jax.experimental.pallas import tpu as pltpu


# ---------------------------------------------------------------------------
# Kernel 1: 1x1 conv (pointwise matmul on the MXU) + BN0 partial statistics.
# Layout: channels on sublanes, flattened spatial (th*W) on lanes.
# ---------------------------------------------------------------------------
def _pointwise_conv_kernel(x_ref, w_ref, b_ref, y_ref, stats_ref):
    # x_ref: (Cin, M)  w_ref: (k, Cin)  b_ref: (k, 1)
    # y_ref: (k, M)    stats_ref: (k, 2) = [sum | sum of squares]
    y = jnp.dot(w_ref[...], x_ref[...], preferred_element_type=jnp.float32) + b_ref[...]
    y_ref[...] = y.astype(y_ref.dtype)
    stats_ref[:, 0:1] = jnp.sum(y, axis=1, keepdims=True)
    stats_ref[:, 1:2] = jnp.sum(y * y, axis=1, keepdims=True)


# ---------------------------------------------------------------------------
# Kernels 2/3: fused BN(prev)+ReLU -> (3,1) conv -> (1,3) conv (+ BN partials).
# Previous activation lives unpadded in HBM; a halo slab is DMA'd manually with
# double buffering (core strip always, d-row halo strips only when in-bounds).
# ---------------------------------------------------------------------------
def _sepconv_kernel(yprev_hbm, wh_ref, bh_ref, wv_ref, bv_ref, sc_ref, sh_ref,
                    y_ref, stats_ref, slab_ref, sem_ref, *, th, W, k, d, T):
    n = pl.program_id(0)
    i = pl.program_id(1)
    M = th * W
    dW = d * W
    L = M + 2 * dW

    def start_fetch(i2, slot):
        base = i2 * M
        # core rows [i2*th, i2*th + th)
        pltpu.make_async_copy(yprev_hbm.at[n, :, pl.ds(base, M)],
                              slab_ref.at[slot, :, pl.ds(dW, M)],
                              sem_ref.at[slot, 1]).start()

        @pl.when(i2 > 0)                          # top halo rows [i2*th - d, i2*th)
        def _():
            pltpu.make_async_copy(yprev_hbm.at[n, :, pl.ds(base - dW, dW)],
                                  slab_ref.at[slot, :, pl.ds(0, dW)],
                                  sem_ref.at[slot, 0]).start()

        @pl.when(i2 < T - 1)                      # bottom halo rows [.., i2*th + th + d)
        def _():
            pltpu.make_async_copy(yprev_hbm.at[n, :, pl.ds(base + M, dW)],
                                  slab_ref.at[slot, :, pl.ds(dW + M, dW)],
                                  sem_ref.at[slot, 2]).start()

    slot = i % 2

    @pl.when(i == 0)                              # prime the pipeline once per image
    def _():
        start_fetch(i, slot)

    @pl.when(i + 1 < T)                           # prefetch next tile of this image
    def _():
        start_fetch(i + 1, (i + 1) % 2)

    # Wait for the current tile's slab (only on DMAs that were actually issued).
    base = i * M
    pltpu.make_async_copy(yprev_hbm.at[n, :, pl.ds(base, M)],
                          slab_ref.at[slot, :, pl.ds(dW, M)],
                          sem_ref.at[slot, 1]).wait()

    @pl.when(i > 0)
    def _():
        pltpu.make_async_copy(yprev_hbm.at[n, :, pl.ds(base - dW, dW)],
                              slab_ref.at[slot, :, pl.ds(0, dW)],
                              sem_ref.at[slot, 0]).wait()

    @pl.when(i < T - 1)
    def _():
        pltpu.make_async_copy(yprev_hbm.at[n, :, pl.ds(base + M, dW)],
                              slab_ref.at[slot, :, pl.ds(dW + M, dW)],
                              sem_ref.at[slot, 2]).wait()

    # Fused BN of the previous layer + ReLU (f32 math regardless of HBM dtype), then
    # zero the halo lanes that fall outside the image: these are the (3,1) conv's zero
    # padding; they must be 0 *after* BN+ReLU (relu(shift) != 0), and at the first/last
    # tile the un-DMA'd strip contents are irrelevant because this mask discards them.
    z = slab_ref[slot].astype(jnp.float32)
    z = jnp.maximum(z * sc_ref[...] + sh_ref[...], 0.0)
    lane = lax.broadcasted_iota(jnp.int32, (k, L), 1)
    valid = jnp.logical_and(jnp.logical_or(i > 0, lane >= dW),
                            jnp.logical_or(i < T - 1, lane < dW + M))
    z = jnp.where(valid, z, 0.0)

    # (3,1) conv along H (dilation d): one fused (k,3k)@(3k,M) MXU matmul over the
    # three row-shifted slab views stacked on the contraction axis.
    z3 = jnp.concatenate([z[:, 0:M], z[:, dW:dW + M], z[:, 2 * dW:2 * dW + M]], axis=0)
    t = jnp.dot(wh_ref[...], z3, preferred_element_type=jnp.float32) + bh_ref[...]

    # (1,3) conv along W (dilation d): one (3k,k)@(k,M) matmul, then static lane shifts
    # of the three k-row tap groups + iota column masks for the W-boundary zero padding.
    u = jnp.dot(wv_ref[...], t, preferred_element_type=jnp.float32)        # (3k, M)
    wcol = lax.broadcasted_iota(jnp.int32, (k, M), 1) % W
    zpad = jnp.zeros((k, d), jnp.float32)
    left = jnp.concatenate([zpad, u[0:k, :M - d]], axis=1)                 # tap reading w-d
    right = jnp.concatenate([u[2 * k:3 * k, d:], zpad], axis=1)            # tap reading w+d
    y = (u[k:2 * k, :] + bv_ref[...]
         + jnp.where(wcol >= d, left, 0.0)
         + jnp.where(wcol < W - d, right, 0.0))

    y_ref[...] = y.astype(y_ref.dtype)
    stats_ref[:, 0:1] = jnp.sum(y, axis=1, keepdims=True)
    stats_ref[:, 1:2] = jnp.sum(y * y, axis=1, keepdims=True)


# ---------------------------------------------------------------------------
# Kernel 4: BN2 + ReLU + dropout scale + channel concat, written directly in
# flattened NCHW (two contiguous sublane slabs, lane-dense stores).
# ---------------------------------------------------------------------------
def _bn_relu_drop_cat_kernel(y_ref, x_ref, sc_ref, sh_ref, drop_ref, o_ref, *, k):
    act = jnp.maximum(y_ref[...].astype(jnp.float32) * sc_ref[...] + sh_ref[...], 0.0)
    o_ref[0:k, :] = (act * drop_ref[...]).astype(o_ref.dtype)
    o_ref[k:, :] = x_ref[...].astype(o_ref.dtype)


# ---------------------------------------------------------------------------
# Glue helpers
# ---------------------------------------------------------------------------
def _bn_affine(stats, gamma, beta, count, eps):
    # stats: (N, T, k, 2) per-block [sum | sum-of-squares] -> fused BN affine (batch stats).
    s = jnp.sum(stats[..., 0], axis=(0, 1))
    ss = jnp.sum(stats[..., 1], axis=(0, 1))
    mean = s / count
    var = jnp.maximum(ss / count - mean * mean, 0.0)     # biased variance (PyTorch training BN)
    scale = gamma.astype(jnp.float32) / jnp.sqrt(var + eps)
    shift = beta.astype(jnp.float32) - mean * scale
    return scale.reshape(-1, 1), shift.reshape(-1, 1)


def _pick_h_tile(H, W, d, c_max, *, bytes_per_elem=4, max_block_bytes=6 << 20, target_t=8):
    # Smallest-regret divisor of H: lane dim th*W must be a multiple of 128 (or th == H),
    # th >= d for the halo DMA, block bytes bounded, and ~target_t grid steps per image.
    cands = []
    for t in range(1, H + 1):
        if H % t or t < d:
            continue
        lane_ok = ((t * W) % 128 == 0) or (t == H)
        size_ok = (t * W * c_max * bytes_per_elem <= max_block_bytes) or (t == H)
        if lane_ok and size_ok:
            cands.append(t)
    return min(cands, key=lambda t: (abs(H // t - target_t), -t))


def _sepconv_call(y_prev, wh, bh, wv, bv, sc, sh, *, d, N, T, th, W, k,
                  store_dtype, compiler_params):
    M = th * W
    L = M + 2 * d * W
    kern = functools.partial(_sepconv_kernel, th=th, W=W, k=k, d=d, T=T)
    return pl.pallas_call(
        kern,
        out_shape=(jax.ShapeDtypeStruct((N, k, T * M), store_dtype),
                   jax.ShapeDtypeStruct((N, T, k, 2), jnp.float32)),
        grid=(N, T),
        in_specs=[
            pl.BlockSpec(memory_space=pl.ANY),                 # previous activation (HBM)
            pl.BlockSpec((k, 3 * k), lambda n, i: (0, 0)),     # fused (3,1) conv taps
            pl.BlockSpec((k, 1), lambda n, i: (0, 0)),         # (3,1) conv bias
            pl.BlockSpec((3 * k, k), lambda n, i: (0, 0)),     # stacked (1,3) conv taps
            pl.BlockSpec((k, 1), lambda n, i: (0, 0)),         # (1,3) conv bias
            pl.BlockSpec((k, 1), lambda n, i: (0, 0)),         # BN(prev) scale
            pl.BlockSpec((k, 1), lambda n, i: (0, 0)),         # BN(prev) shift
        ],
        out_specs=(
            pl.BlockSpec((None, k, M), lambda n, i: (n, 0, i)),
            pl.BlockSpec((None, None, k, 2), lambda n, i: (n, i, 0, 0)),
        ),
        scratch_shapes=[
            pltpu.VMEM((2, k, L), store_dtype),                # double-buffered halo slab
            pltpu.SemaphoreType.DMA((2, 3)),                   # per slot: {top, core, bottom}
        ],
        compiler_params=compiler_params,
    )(y_prev, wh, bh, wv, bv, sc, sh)


# ---------------------------------------------------------------------------
# EDABlock forward
# ---------------------------------------------------------------------------
def eda_block(x_nchw, params, *, dilated, drop_scale=None, eps=1e-5,
              h_tile=None, store_dtype=jnp.bfloat16, vmem_limit_bytes=None):
    N, Cin, H, W = (int(v) for v in x_nchw.shape)
    k = int(params["conv1x1_w"].shape[0])
    d = int(dilated)
    f32 = jnp.float32
    assert 1 <= d <= H and d < W

    if h_tile is None:
        h_tile = _pick_h_tile(H, W, d, k + Cin)
    th = int(h_tile)
    T = H // th
    M = th * W
    S = H * W
    assert H % th == 0 and th >= d
    assert (M % 128 == 0) or (th == H)

    cp_par = pltpu.CompilerParams(dimension_semantics=("parallel", "parallel"),
                                  vmem_limit_bytes=vmem_limit_bytes)
    cp_seq = pltpu.CompilerParams(dimension_semantics=("parallel", "arbitrary"),
                                  vmem_limit_bytes=vmem_limit_bytes)

    # Flattened NCHW activations: channels on sublanes, H*W on lanes. No transposes.
    x_flat = x_nchw.reshape(N, Cin, S).astype(f32)

    # Weight packing for the fused per-tap matmuls.
    w1 = params["conv1x1_w"][:, :, 0, 0].astype(f32)                          # (k, Cin)
    b1 = params["conv1x1_b"].reshape(k, 1).astype(f32)

    def pack_h(w):   # (k,k,3,1) -> (k, 3k): taps stacked on the contraction axis
        return jnp.concatenate([w[:, :, t, 0] for t in range(3)], axis=1).astype(f32)

    def pack_v(w):   # (k,k,1,3) -> (3k, k): taps stacked on the output axis
        return jnp.concatenate([w[:, :, 0, t] for t in range(3)], axis=0).astype(f32)

    wh1 = pack_h(params["conv3x1_1_w"]); bh1 = params["conv3x1_1_b"].reshape(k, 1).astype(f32)
    wv1 = pack_v(params["conv1x3_1_w"]); bv1 = params["conv1x3_1_b"].reshape(k, 1).astype(f32)
    wh2 = pack_h(params["conv3x1_2_w"]); bh2 = params["conv3x1_2_b"].reshape(k, 1).astype(f32)
    wv2 = pack_v(params["conv1x3_2_w"]); bv2 = params["conv1x3_2_b"].reshape(k, 1).astype(f32)

    count = float(N * S)

    # ---- kernel 1: conv1x1 + BN0 partial statistics ---------------------------------
    y0, stats0 = pl.pallas_call(
        _pointwise_conv_kernel,
        out_shape=(jax.ShapeDtypeStruct((N, k, S), store_dtype),
                   jax.ShapeDtypeStruct((N, T, k, 2), f32)),
        grid=(N, T),
        in_specs=[
            pl.BlockSpec((None, Cin, M), lambda n, i: (n, 0, i)),
            pl.BlockSpec((k, Cin), lambda n, i: (0, 0)),
            pl.BlockSpec((k, 1), lambda n, i: (0, 0)),
        ],
        out_specs=(
            pl.BlockSpec((None, k, M), lambda n, i: (n, 0, i)),
            pl.BlockSpec((None, None, k, 2), lambda n, i: (n, i, 0, 0)),
        ),
        compiler_params=cp_par,
    )(x_flat, w1, b1)
    scale0, shift0 = _bn_affine(stats0, params["bn0_g"], params["bn0_b"], count, eps)

    # ---- kernel 2: BN0+ReLU -> conv3x1_1 -> conv1x3_1 + BN1 partials ----------------
    y1, stats1 = _sepconv_call(y0, wh1, bh1, wv1, bv1, scale0, shift0,
                               d=1, N=N, T=T, th=th, W=W, k=k,
                               store_dtype=store_dtype, compiler_params=cp_seq)
    scale1, shift1 = _bn_affine(stats1, params["bn1_g"], params["bn1_b"], count, eps)

    # ---- kernel 3: BN1+ReLU -> conv3x1_2 -> conv1x3_2 (dilated) + BN2 partials ------
    y2, stats2 = _sepconv_call(y1, wh2, bh2, wv2, bv2, scale1, shift1,
                               d=d, N=N, T=T, th=th, W=W, k=k,
                               store_dtype=store_dtype, compiler_params=cp_seq)
    scale2, shift2 = _bn_affine(stats2, params["bn2_g"], params["bn2_b"], count, eps)

    # ---- dropout (Dropout2d, channel-wise), deterministic mask from the caller ------
    # TODO(synk): PyTorch training-mode Dropout2d draws from torch's RNG and BatchNorm
    # updates running_mean/var in-place; neither module side effect is reproduced here.
    if drop_scale is None:
        drop_scale = jnp.ones((N, k), f32)
    drop3 = drop_scale.astype(f32).reshape(N, k, 1)

    # ---- kernel 4: BN2 + ReLU + dropout + channel concat (flattened NCHW output) ----
    out_flat = pl.pallas_call(
        functools.partial(_bn_relu_drop_cat_kernel, k=k),
        out_shape=jax.ShapeDtypeStruct((N, k + Cin, S), f32),
        grid=(N, T),
        in_specs=[
            pl.BlockSpec((None, k, M), lambda n, i: (n, 0, i)),
            pl.BlockSpec((None, Cin, M), lambda n, i: (n, 0, i)),
            pl.BlockSpec((k, 1), lambda n, i: (0, 0)),
            pl.BlockSpec((k, 1), lambda n, i: (0, 0)),
            pl.BlockSpec((None, k, 1), lambda n, i: (n, 0, 0)),
        ],
        out_specs=pl.BlockSpec((None, k + Cin, M), lambda n, i: (n, 0, i)),
        compiler_params=cp_par,
    )(y2, x_flat, scale2, shift2, drop3)

    return out_flat.reshape(N, k + Cin, H, W)


# ---------------------------------------------------------------------------
# Pure-JAX reference (mirrors the PyTorch forward, shares the dropout mask)
# ---------------------------------------------------------------------------
def _reference(x, p, dilated, drop_scale, eps=1e-5):
    f32 = jnp.float32

    def conv(inp, w, b, pad, dil):
        out = lax.conv_general_dilated(
            inp.astype(f32), w.astype(f32), window_strides=(1, 1),
            padding=((pad[0], pad[0]), (pad[1], pad[1])), rhs_dilation=dil,
            dimension_numbers=("NCHW", "OIHW", "NCHW"), precision=lax.Precision.HIGHEST)
        return out + b.reshape(1, -1, 1, 1)

    def bn_relu(y, g, b):
        mean = jnp.mean(y, axis=(0, 2, 3), keepdims=True)
        var = jnp.mean((y - mean) ** 2, axis=(0, 2, 3), keepdims=True)
        yn = (y - mean) / jnp.sqrt(var + eps) * g.reshape(1, -1, 1, 1) + b.reshape(1, -1, 1, 1)
        return jnp.maximum(yn, 0.0)

    y = conv(x, p["conv1x1_w"], p["conv1x1_b"], (0, 0), (1, 1))
    y = bn_relu(y, p["bn0_g"], p["bn0_b"])
    y = conv(y, p["conv3x1_1_w"], p["conv3x1_1_b"], (1, 0), (1, 1))
    y = conv(y, p["conv1x3_1_w"], p["conv1x3_1_b"], (0, 1), (1, 1))
    y = bn_relu(y, p["bn1_g"], p["bn1_b"])
    y = conv(y, p["conv3x1_2_w"], p["conv3x1_2_b"], (dilated, 0), (dilated, dilated))
    y = conv(y, p["conv1x3_2_w"], p["conv1x3_2_b"], (0, dilated), (dilated, dilated))
    y = bn_relu(y, p["bn2_g"], p["bn2_b"])
    y = y * drop_scale[:, :, None, None]
    return jnp.concatenate([y, x.astype(f32)], axis=1)


if __name__ == "__main__":
    N, Cin, H, W = 2, 8, 16, 16
    k, dilated, dropprob = 16, 2, 0.02

    key = jax.random.PRNGKey(0)
    ks = jax.random.split(key, 18)

    def rnd(kk, shape, s=0.1):
        return s * jax.random.normal(kk, shape, dtype=jnp.float32)

    x = jax.random.normal(ks[0], (N, Cin, H, W), dtype=jnp.float32)
    params = dict(
        conv1x1_w=rnd(ks[1], (k, Cin, 1, 1)), conv1x1_b=rnd(ks[2], (k,)),
        bn0_g=1.0 + rnd(ks[3], (k,)), bn0_b=rnd(ks[4], (k,)),
        conv3x1_1_w=rnd(ks[5], (k, k, 3, 1)), conv3x1_1_b=rnd(ks[6], (k,)),
        conv1x3_1_w=rnd(ks[7], (k, k, 1, 3)), conv1x3_1_b=rnd(ks[8], (k,)),
        bn1_g=1.0 + rnd(ks[9], (k,)), bn1_b=rnd(ks[10], (k,)),
        conv3x1_2_w=rnd(ks[11], (k, k, 3, 1)), conv3x1_2_b=rnd(ks[12], (k,)),
        conv1x3_2_w=rnd(ks[13], (k, k, 1, 3)), conv1x3_2_b=rnd(ks[14], (k,)),
        bn2_g=1.0 + rnd(ks[15], (k,)), bn2_b=rnd(ks[16], (k,)),
    )
    # Deterministic Dropout2d keep/scale mask (training mode), shared with the reference.
    keep = (jax.random.uniform(ks[17], (N, k)) >= dropprob).astype(jnp.float32)
    drop_scale = keep / (1.0 - dropprob)

    ref = _reference(x, params, dilated, drop_scale)

    # f32 intermediates: tight correctness check.
    out32 = eda_block(x, params, dilated=dilated, drop_scale=drop_scale,
                      store_dtype=jnp.float32)
    out32 = jax.block_until_ready(out32)
    assert out32.shape == (N, k + Cin, H, W)
    err32 = float(jnp.max(jnp.abs(out32 - ref)))
    assert jnp.allclose(out32, ref, atol=1e-2, rtol=1e-2), f"f32 max abs err {err32}"

    # bf16 intermediates (default performance mode): looser check for rounding.
    out16 = eda_block(x, params, dilated=dilated, drop_scale=drop_scale,
                      store_dtype=jnp.bfloat16)
    out16 = jax.block_until_ready(out16)
    err16 = float(jnp.max(jnp.abs(out16 - ref)))
    assert jnp.allclose(out16, ref, atol=8e-2, rtol=8e-2), f"bf16 max abs err {err16}"

    print("KERNEL_OK")
</pallas_src>

<mosaic_0001>
module attributes {stable_mosaic.version = 11 : i64} {
  func.func @_pointwise_conv_kernel(%arg0: i32, %arg1: i32, %arg2: memref<1x8x128xf32, #tpu.memory_space<vmem>>, %arg3: memref<16x8xf32, #tpu.memory_space<vmem>>, %arg4: memref<16x1xf32, #tpu.memory_space<vmem>>, %arg5: memref<1x16x128xf32, #tpu.memory_space<vmem>>, %arg6: memref<1x1x16x2xf32, #tpu.memory_space<vmem>>) attributes {dimension_semantics = [#tpu.dimension_semantics<parallel>, #tpu.dimension_semantics<parallel>], iteration_bounds = array<i64: 2, 2>, scalar_prefetch = 0 : i64, scratch_operands = 0 : i64, tpu.core_type = #tpu.core_type<tc>, window_params = [{transform_indices = @transform_0, window_bounds = array<i64: 1, 8, 128>}, {pipeline_mode = #tpu.pipeline_mode<synchronous>, transform_indices = @transform_1, window_bounds = array<i64: 16, 8>}, {pipeline_mode = #tpu.pipeline_mode<synchronous>, transform_indices = @transform_2, window_bounds = array<i64: 16, 1>}, {transform_indices = @transform_3, window_bounds = array<i64: 1, 16, 128>}, {transform_indices = @transform_4, window_bounds = array<i64: 1, 1, 16, 2>}]} {
    %c0 = arith.constant 0 : index
    %c0_0 = arith.constant 0 : index
    %0 = vector.load %arg3[%c0, %c0_0] : memref<16x8xf32, #tpu.memory_space<vmem>>, vector<16x8xf32>
    %c0_1 = arith.constant 0 : index
    %c0_2 = arith.constant 0 : index
    %c0_3 = arith.constant 0 : index
    %1 = vector.load %arg2[%c0_1, %c0_2, %c0_3] : memref<1x8x128xf32, #tpu.memory_space<vmem>>, vector<1x8x128xf32>
    %2 = vector.shape_cast %1 : vector<1x8x128xf32> to vector<8x128xf32>
    %cst = arith.constant dense<0.000000e+00> : vector<16x128xf32>
    %3 = tpu.matmul %0, %2, %cst {dimension_numbers = #tpu.dot_dimension_numbers<[1], [0], [0], [1], [0, 0, 1, 1], [], []>} : vector<16x8xf32>, vector<8x128xf32>, vector<16x128xf32> -> vector<16x128xf32>
    %c0_4 = arith.constant 0 : index
    %c0_5 = arith.constant 0 : index
    %4 = vector.load %arg4[%c0_4, %c0_5] : memref<16x1xf32, #tpu.memory_space<vmem>>, vector<16x1xf32>
    %5 = vector.broadcast %4 : vector<16x1xf32> to vector<16x128xf32>
    %6 = arith.addf %3, %5 : vector<16x128xf32>
    %c0_6 = arith.constant 0 : index
    %c0_7 = arith.constant 0 : index
    %c0_8 = arith.constant 0 : index
    %7 = vector.load %arg5[%c0_6, %c0_7, %c0_8] : memref<1x16x128xf32, #tpu.memory_space<vmem>>, vector<1x16x128xf32>
    %8 = vector.shape_cast %7 : vector<1x16x128xf32> to vector<16x128xf32>
    %9 = vector.shape_cast %6 : vector<16x128xf32> to vector<1x16x128xf32>
    tpu.vector_store %arg5[%c0_6, %c0_7, %c0_8], %9 {strides = array<i32>} : memref<1x16x128xf32, #tpu.memory_space<vmem>>, vector<1x16x128xf32>,
    %cst_9 = arith.constant dense<0.000000e+00> : vector<16xf32>
    %10 = vector.multi_reduction <add>, %6, %cst_9 [1] : vector<16x128xf32> to vector<16xf32>
    %11 = vector.shape_cast %10 : vector<16xf32> to vector<16x1xf32>
    %c0_10 = arith.constant 0 : index
    %c0_11 = arith.constant 0 : index
    %c0_12 = arith.constant 0 : index
    %c0_13 = arith.constant 0 : index
    %12 = vector.load %arg6[%c0_10, %c0_11, %c0_12, %c0_13] : memref<1x1x16x2xf32, #tpu.memory_space<vmem>>, vector<1x1x16x1xf32>
    %13 = vector.shape_cast %12 : vector<1x1x16x1xf32> to vector<16x1xf32>
    %14 = vector.shape_cast %11 : vector<16x1xf32> to vector<1x1x16x1xf32>
    tpu.vector_store %arg6[%c0_10, %c0_11, %c0_12, %c0_13], %14 {strides = array<i32>} : memref<1x1x16x2xf32, #tpu.memory_space<vmem>>, vector<1x1x16x1xf32>,
    %15 = arith.mulf %6, %6 : vector<16x128xf32>
    %cst_14 = arith.constant dense<0.000000e+00> : vector<16xf32>
    %16 = vector.multi_reduction <add>, %15, %cst_14 [1] : vector<16x128xf32> to vector<16xf32>
    %17 = vector.shape_cast %16 : vector<16xf32> to vector<16x1xf32>
    %c0_15 = arith.constant 0 : index
    %c0_16 = arith.constant 0 : index
    %c0_17 = arith.constant 0 : index
    %c1 = arith.constant 1 : index
    %18 = vector.load %arg6[%c0_15, %c0_16, %c0_17, %c1] : memref<1x1x16x2xf32, #tpu.memory_space<vmem>>, vector<1x1x16x1xf32>
    %19 = vector.shape_cast %18 : vector<1x1x16x1xf32> to vector<16x1xf32>
    %20 = vector.shape_cast %17 : vector<16x1xf32> to vector<1x1x16x1xf32>
    tpu.vector_store %arg6[%c0_15, %c0_16, %c0_17, %c1], %20 {strides = array<i32>} : memref<1x1x16x2xf32, #tpu.memory_space<vmem>>, vector<1x1x16x1xf32>,
    return
  }
  func.func @transform_0(%arg0: i32, %arg1: i32) -> (i32, i32, i32) {
    %c0_i32 = arith.constant 0 : i32
    %c0_i32_0 = arith.constant 0 : i32
    return %arg0, %c0_i32, %arg1 : i32, i32, i32
  }
  func.func @transform_1(%arg0: i32, %arg1: i32) -> (i32, i32) {
    %c0_i32 = arith.constant 0 : i32
    %c0_i32_0 = arith.constant 0 : i32
    %c0_i32_1 = arith.constant 0 : i32
    return %c0_i32, %c0_i32_0 : i32, i32
  }
  func.func @transform_2(%arg0: i32, %arg1: i32) -> (i32, i32) {
    %c0_i32 = arith.constant 0 : i32
    %c0_i32_0 = arith.constant 0 : i32
    %c0_i32_1 = arith.constant 0 : i32
    return %c0_i32, %c0_i32_0 : i32, i32
  }
  func.func @transform_3(%arg0: i32, %arg1: i32) -> (i32, i32, i32) {
    %c0_i32 = arith.constant 0 : i32
    %c0_i32_0 = arith.constant 0 : i32
    return %arg0, %c0_i32, %arg1 : i32, i32, i32
  }
  func.func @transform_4(%arg0: i32, %arg1: i32) -> (i32, i32, i32, i32) {
    %c0_i32 = arith.constant 0 : i32
    %c0_i32_0 = arith.constant 0 : i32
    %c0_i32_1 = arith.constant 0 : i32
    return %arg0, %arg1, %c0_i32, %c0_i32_0 : i32, i32, i32, i32
  }
}

</mosaic_0001>

<bundles_post_ra>
// kernel: tpu_custom_call.1
= control target key start
LH: loop header
LB: loop body
LE: loop exit
PB: predicated region body
PF: predicated region fallthrough
CT: control target
= control target key end

     0   :  { %10 = vsyncpa [#allocation3], 0  ;;  %s893_s0 = inlined_call_operand.vmem [shape: f32[2,8,256], index: 0, kind: input, shape index: {}]   ;;  %s894_s1 = inlined_call_operand.vmem [shape: f32[16,8], index: 1, kind: input, shape index: {}]   ;;  %s895_s2 = inlined_call_operand.vmem [shape: f32[16,1], index: 2, kind: input, shape index: {}]   ;;  %s896_s3 = inlined_call_operand.hbm [shape: f32[2,16,256], index: 3, kind: output, shape index: {0}]   ;;  %s897_s4 = inlined_call_operand.vmem [shape: f32[2,2,16,2], index: 4, kind: output, shape index: {1}]  }
   0x1   :  { %12 = vsyncpa [#allocation3 + $0x1], 0  ;;  %s734_s15 = smov 0   ;;  %s736_s16 = smov 0  }
   0x2   :  { %s738_s17 = smov 0   ;;  %s740_s18 = smov 0  }
   0x3   :  { %s742_s19 = smov 0   ;;  %s744_s20 = smov 0  }
   0x4   :  { %s746_s21 = smov 0   ;;  %s748_s22 = smov 0  }
   0x5 LB: > { %s508_s23 = sadd.s32 4294967295, %s702_s22   ;;  %s509_s24 = sadd.s32 4294967294, %s702_s22   ;;  %s702_s22 = sphi %s748_s22, %s18_s22   ;;  %s698_s21 = sphi %s746_s21, %s906_s21   ;;  %s694_s20 = sphi %s744_s20, %s905_s20   ;;  %s690_s19 = sphi %s742_s19, %s904_s19   ;;  %s686_s18 = sphi %s740_s18, %s903_s18   ;;  %s682_s17 = sphi %s738_s17, %s902_s17   ;;  %s678_s16 = sphi %s736_s16, %s901_s16   ;;  %s674_s15 = sphi %s734_s15, %s900_s15  }
   0x6   : > { %s27_s25 = sadd.s32 1, %s694_s20  ;;  %s30_s26 = sadd.s32 1, %s698_s21 }
   0x7   : > { %p28_p0 = scmp.ge.s32.totalorder %s27_s25, 2  ;;  %p119_p1 = scmp.ne.s32.totalorder %s682_s17, %s678_s16 }
   0x8   : > { %p120_p2 = scmp.eq.s32.totalorder %s508_s23, 3  ;;  %p125_p5 = scmp.ne.s32.totalorder %s678_s16, %s674_s15 }
   0x9   : > { %s908_s25 = smov (%p28_p0, %s27_s25), 0  ;;  %s910_s26 = smov (!%p28_p0, %s30_s26), %s698_s21 }
   0xa   : > { %s105_s27 = ssub.s32 %s694_s20, %s908_s25  ;;  %p785_p3 = por %p120_p2, %p119_p1 }
   0xb   : > { %p32_p4 = scmp.ge.s32.totalorder %s910_s26, 2  ;;  %p126_p6 = scmp.eq.s32.totalorder %s509_s24, 3 }
   0xc   : > { %p512_p7 = scmp.ge.s32.totalorder %s702_s22, 1  ;;  %p189_p9 = scmp.lt.s32.totalorder %s702_s22, 5 }
   0xd   : > { %s912_s26 = smov (%p32_p4, %s910_s26), 0  ;;  %p794_p8 = por %p126_p6, %p125_p5 }
   0xe   : > { %s104_s30 = ssub.s32 %s698_s21, %s912_s26  ;;  %s109_s5 = sadd.s32 1, %s682_s17 }
   0xf   : > { %s106_s6 = sor.u32 %s105_s27, %s104_s30  ;;  %p190_p10 = pnand %p512_p7, %p189_p9 }
  0x10   : > { %p107_p11 = scmp.eq.s32.totalorder %s106_s6, 0  ;;  %p227_p12 = scmp.lt.s32.totalorder (!%p190_p10), %s690_s19, 1 }
  0x11   : > { %193 = sbr.rel (%p190_p10) target bundleno = 373 (0x175), region = 32  ;;  %p229_p13 = scmp.lt.s32.totalorder (!%p190_p10), %s686_s18, 1 }
  0x12   : > { %s803_s7 = scalar_select %p107_p11, %s682_s17, %s109_s5  }
  0x16   : > { %v244_v0 = vld [vmem:[%s894_s1] sm:$0xff]  ;;  %vm259_vm0 = vcmask 64512   ;;  %v704_v1 = vmov 0   ;;  %s228_s12 = scalar_select %p227_p12, %s690_s19, 1  ;;  %v248_v3 = vld [vmem:[%s895_s2 + $0x8] sm:$0xff] }
  0x17   : > { %531 = vmatprep.mubr.msk.f32.mxu0 %vm259_vm0, %v244_v0  ;;  %609 = vset.pattern.permute.xlu0 %v704_v1  ;;  %v247_v2 = vld [vmem:[%s895_s2] sm:$0xff]  ;;  %s230_s13 = scalar_select %p229_p13, %s686_s18, 1  ;;  %v245_v5 = vld [vmem:[%s894_s1 + $0x8] sm:$0xff] }
  0x18   : > { %251 = vperm.xlu0 %609, %v247_v2   ;;  %s514_s24 = sshll.u32 %s228_s12, 1  ;;  %s517_s14 = sshll.u32 %s228_s12, 2 }
  0x19   : > { %s232_s27 = sadd.s32 %s514_s24, %s230_s13  ;;  %s516_s11 = sshll.u32 %s230_s13, 1 }
  0x1a   : > { %s515_s30 = sshll.u32 %s232_s27, 3  ;;  %s826_s23 = sadd.s32 %s517_s14, %s516_s11 }
  0x1b   : > { %s234_s8 = scalar_lea.vmem %s893_s0, %s515_s30  ;;  %s213_s24 = sand.u32 1, %s678_s16  }
  0x1c   : > { %256 = vperm.xlu0 %609, %v248_v3   ;;  %v246_v4 = vld [vmem:[%s234_s8] sm:$0xff]  ;;  %s513_s27 = sshll.u32 %s213_s24, 4  ;;  %s522_s13 = sshll.u32 %s690_s19, 2 }
  0x1d   : > { %529 = vmatprep.subr.mxu0 %v246_v4  ;;  %s215_s30 = scalar_lea.vmem [#allocation2], %s513_s27  ;;  %s380_s5 = sadd.s32 %s686_s18, %s522_s13 }
  0x1e   : > { %530 = vmatpush3.msra.mxu0 %v246_v4  ;;  %s383_s12 = sshll.u32 %s215_s30, 4  ;;  %s523_s6 = sshll.u32 %s380_s5, 7  ;;  %s831_s12 = int_to_ptr.vmem [resolvable:$true] %s383_s12 }
  0x1f   : > { %532 = vmatmul.mubr.msk.f32.vlgmr.msra.gmra.mxu0 %vm259_vm0, %v245_v5  ;;  %s836_s10 = scalar_lea.hbm %s896_s3, %s523_s6  ;;  %s838_s11 = scalar_lea.sflag [#allocation3], %s213_s24 }
  0x20   : > { %s610_s14 = scalar_lea.vmem %s831_s12, 256  ;;  %s705_s19 = smov [#allocation2]  }
  0x21   : > { %p611_p0 = scmp.ne.s32.totalorder %s831_s12, %s610_s14  ;;  %s614_s18 = sshll.u32 %s705_s19, 4  ;;  %s615_s18 = int_to_ptr.vmem [resolvable:$false] %s614_s18 }
  0x22   : > { %s616_s27 = scalar_lea.vmem %s615_s18, 512  ;;  %p617_p4 = scmp.lt.s32.totalorder %s831_s12, %s615_s18 }
  0x23   : > { %p612_p1 = pnand %p611_p0, %p785_p3  ;;  %p618_p5 = scmp.lt.s32.totalorder %s616_s27, %s610_s14 }
  0x25   : > { %p613_p2 = pneg %p612_p1  ;;  %p619_p6 = por %p618_p5, %p617_p4 }
  0x27   : > { %p620_p7 = pnand %p619_p6, %p613_p2 }
  0x93   : > { %v252_v6 = vpop.permute.xlu0 %251 }
  0x97   : > { %v257_v7 = vpop.permute.xlu0 %256 }
  0xdf   : > { %v533_v8 = vpop.f32.mrf.mxu0 }
  0xe0   : > { %v338_v9 = vadd.f32 %v533_v8, %v257_v7 }
  0xe1   : > { %v332_v10 = vpop.f32.mrf.mxu0 }
  0xe2   : > { %342 = vst [vmem:[%s215_s30 + $0x8] sm:$0xff] %v338_v9  ;;  %v333_v11 = vadd.f32 %v332_v10, %v252_v6  ;;  %345 = vadd.xlane.f32.xlu1 %v338_v9  ;;  %v351_v13 = vmul.f32 %v338_v9, %v338_v9 }
  0xe4   : > { %341 = vst [vmem:[%s215_s30] sm:$0xff] %v333_v11  ;;  %v350_v12 = vmul.f32 %v333_v11, %v333_v11 }
  0xe6   : > { %343 = vadd.xlane.f32.xlu1 %v333_v11  ;;  %352 = vadd.xlane.f32.xlu0 %v350_v12 }
  0xea   : > { %354 = vadd.xlane.f32.xlu1 %v351_v13 }
  0xeb   : > { %623 = shalt.err (!%p620_p7)
}
  0xec   : > { %s624_s24 = scalar_lea.hbm %s836_s10, 256  ;;  %s628_s5 = scalar_lea.hbm %s896_s3, 1024 }
  0xed   : > { %p625_p9 = scmp.ne.s32.totalorder %s836_s10, %s624_s24  ;;  %p629_p12 = scmp.lt.s32.totalorder %s836_s10, %s896_s3 }
  0xee   : > { %p630_p13 = scmp.lt.s32.totalorder %s628_s5, %s624_s24 }
  0xef   : > { %p626_p10 = pnand %p625_p9, %p785_p3 }
  0xf0   : > { %p631_p0 = por %p630_p13, %p629_p12 }
  0xf1   : > { %p627_p11 = pneg %p626_p10 }
  0xf3   : > { %p632_p1 = pnand %p631_p0, %p627_p11 }
  0xf5   : > { %635 = shalt.err (!%p632_p1)
}
  0xf6   : > { %s706_s9 = smov 128   ;;  %s707_s14 = smov 256   ;;  %vm347_vm1 = vcmask 7168   ;;  %vm356_vm2 = vcmask 15368  }
  0xf7   : > { %s708_s19 = smov 8   ;;  %s518_s18 = sshll.u32 %s826_s23, 3 }
  0xf8   : > { %534 = dma.vmem_to_hbm [thread:$0]  (%p785_p3), %s831_s12, 256, %s836_s10, %s838_s11, %s706_s9, %s707_s14, %s708_s19  }
  0xf9   : > { %s243_s13 = scalar_lea.vmem %s897_s4, %s518_s18 }
 0x16b   : > { %v346_v14 = vpop.xlane.xlu1 %345 }
 0x16c   : > { %349 = vst.msk [vmem:[%s243_s13 + $0x8] sm:$0xff] %vm347_vm1, %v346_v14 }
 0x16f   : > { %v344_v15 = vpop.xlane.xlu1 %343  ;;  %v353_v16 = vpop.xlane.xlu0 %352 }
 0x170   : > { %348 = vst.msk [vmem:[%s243_s13] sm:$0xff] %vm347_vm1, %v344_v15 }
 0x171   : > { %357 = vst.msk [vmem:[%s243_s13] sm:$0xff] %vm356_vm2, %v353_v16 }
 0x173   : > { %v355_v17 = vpop.xlane.xlu1 %354 }
 0x174   : > { %358 = vst.msk [vmem:[%s243_s13 + $0x8] sm:$0xff] %vm356_vm2, %v355_v17 }
 0x175 PF: > { %p540_p3 = scmp.ge.s32.totalorder %s702_s22, 2  ;;  %s401_s28 = sand.u32 1, %s674_s15  }
 0x176   : > { %s402_s23 = scalar_lea.sflag [#allocation3], %s401_s28 }
 0x177   : > { %p537_p2 = pnand %p540_p3, %p794_p8 }
 0x179   : > { %p538_p4 = pneg %p537_p2 }
 0x17b   : > { %669 = dma.done.wait (%p538_p4), %s402_s23, 256  }
 0x17c   : > { %671 = vsyncadd (%p538_p4), %s402_s23, 4294967040  ;;  %s18_s22 = sadd.s32 1, %s702_s22   ;;  %s900_s15 = smov %s678_s16 }
 0x17d   : > { %p15_p5 = scmp.ge.s32.totalorder %s18_s22, 6   ;;  %s901_s16 = smov %s682_s17 }
 0x17e   : > { %s902_s17 = smov %s803_s7  ;;  %s903_s18 = smov %s694_s20 }
 0x17f   : > { %s904_s19 = smov %s698_s21  ;;  %s905_s20 = smov %s908_s25 }
 0x180   : > { %s906_s21 = smov %s912_s26  ;;  %17 = sbr.rel (!%p15_p5) target bundleno = 5 (0x5), region = 79 }
 0x185   :  { %419 = vsyncpa [#allocation3], 1 }
 0x186   :  { %421 = vsyncpa [#allocation3 + $0x1], 1 }

</bundles_post_ra>
